<compile_context>
chip_gen: v7x
topology: tpu7x:2x2x1
jax: 0.10.0
libtpu: 0.0.40
codegen_flags: <defaults>
</compile_context>

<pallas_src>
import functools

import jax
import jax.numpy as jnp
from jax.experimental import pallas as pl
from jax.experimental.pallas import tpu as pltpu


def _round_up(x: int, m: int) -> int:
    return ((x + m - 1) // m) * m


def _kernel(stu_ref, wci_ref, wf_ref, beff_ref, out_ref):
    """out = stu + ((stu_bf16 @ [wc|wi])_bf16 @ wf + b_eff)   (per row tile)."""
    x32 = stu_ref[...]                       # (TM, K) f32, kept for residual add
    x = x32.astype(jnp.bfloat16)             # bf16 MXU inputs, f32 accumulation

    # stage 1: g = x @ [wc | wi]  -> (TM, 2K) f32
    g = jnp.dot(x, wci_ref[...], preferred_element_type=jnp.float32)

    # stage 2: fusion = g @ wf + b_eff   (b_eff = [bc | bi] @ wf + bf, folded)
    fusion = jnp.dot(g.astype(jnp.bfloat16), wf_ref[...],
                     preferred_element_type=jnp.float32) + beff_ref[...]

    out_ref[...] = x32 + fusion


def expression_single_eva(exer_emb, all_stu_emb, params, *, tile_m=2048):
    """Forward pass.  `exer_emb` is accepted for API parity with the PyTorch
    module; under the dense-Linear model of the graph layers its rows never
    reach the returned student embeddings, so it is not fed to the kernel.

    all_stu_emb : (student_n, K) f32
    params      : wc, wi (K, K), wf (2K, K) (already W.T for x @ W), biases (1, K)
    returns     : (student_n, K) f32
    """
    del exer_emb  # dead under the dense row-wise model of the graph layers
    S, K = all_stu_emb.shape
    if all_stu_emb.dtype != jnp.float32:
        all_stu_emb = all_stu_emb.astype(jnp.float32)

    # --- row tiling -------------------------------------------------------
    tile_m = max(8, _round_up(int(tile_m), 8))               # sublane rule (8,·)
    # Keep >= 2 grid steps whenever S allows it (v7x has 2 TensorCores/chip).
    tm = min(tile_m, max(8, _round_up(-(-S // 2), 8)))
    grid = (pl.cdiv(S, tm),)   # partial last block is fine: math is row-wise
                               # and out-of-bounds rows are never written back.

    # --- weight prep (tiny, one-time) --------------------------------------
    wci = jnp.concatenate([params["wc"], params["wi"]], axis=1).astype(jnp.bfloat16)
    wf = params["wf"].astype(jnp.bfloat16)
    b_eff = (jnp.concatenate([params["bc"], params["bi"]], axis=1) @ params["wf"]
             + params["bf"]).astype(jnp.float32)

    row_spec = pl.BlockSpec((tm, K), lambda i: (i, 0))        # streamed rows

    def resident(shape):        # constant block index -> stays VMEM-resident
        return pl.BlockSpec(shape, lambda i: (0, 0))

    # --- VMEM budget (padded-layout estimate, default double-buffering) ----
    lane = lambda n: _round_up(n, 128)
    sub = lambda n: _round_up(n, 8)
    vmem_bytes = (
        2 * 2 * sub(tm) * lane(K) * 4          # row tiles, in + out
        + 2 * sub(K) * lane(2 * K) * 2         # [wc | wi] bf16
        + 2 * sub(2 * K) * lane(K) * 2         # wf bf16
        + 2 * sub(1) * lane(K) * 4             # b_eff f32
    )
    # TODO(synk): for very large K, single-buffer the resident weights
    #             (pipeline_mode=pl.Buffered(1)) instead of only raising the limit.
    vmem_limit = int(min(max(2 * vmem_bytes + (2 << 20), 32 << 20), 64 << 20))

    cost = pl.CostEstimate(
        flops=2 * S * K * (2 * K) + 2 * S * (2 * K) * K,      # two matmuls / row
        transcendentals=0,
        bytes_accessed=2 * S * K * 4 + 2 * (2 * K * K) * 2 + K * 4,
    )

    return pl.pallas_call(
        _kernel,
        out_shape=jax.ShapeDtypeStruct((S, K), jnp.float32),
        grid=grid,
        in_specs=[
            row_spec,                        # student rows (streamed)
            resident((K, 2 * K)),            # [wc | wi]  bf16
            resident((2 * K, K)),            # wf         bf16
            resident((1, K)),                # b_eff      f32
        ],
        out_specs=row_spec,
        input_output_aliases={0: 0},         # out = stu + fusion (in place if donated)
        compiler_params=pltpu.CompilerParams(
            dimension_semantics=("parallel",),   # megacore-shardable row axis
            vmem_limit_bytes=vmem_limit,
        ),
        cost_estimate=cost,
    )(all_stu_emb, wci, wf, b_eff)


def init_params(key, knowledge_dim):
    """Deterministic synthetic parameter init (mirrors the nn.Linear shapes)."""
    K = knowledge_dim
    ks = jax.random.split(key, 6)
    s1 = 1.0 / jnp.sqrt(K)
    s2 = 1.0 / jnp.sqrt(2 * K)
    return {
        # u_from_e_correct ~ Linear(K, K): stored as (in, out) for x @ W
        "wc": jax.random.uniform(ks[0], (K, K), jnp.float32, -s1, s1),
        "bc": jax.random.uniform(ks[1], (1, K), jnp.float32, -s1, s1),
        # u_from_e_incorrect ~ Linear(K, K)
        "wi": jax.random.uniform(ks[2], (K, K), jnp.float32, -s1, s1),
        "bi": jax.random.uniform(ks[3], (1, K), jnp.float32, -s1, s1),
        # fusion_layer = Linear(2K, K); PyTorch weight is (K, 2K), we store W.T
        "wf": jax.random.uniform(ks[4], (2 * K, K), jnp.float32, -s2, s2),
        "bf": jax.random.uniform(ks[5], (1, K), jnp.float32, -s2, s2),
    }


def reference_forward_f32(exer_emb, all_stu_emb, params, exer_n):
    """Pure-JAX f32 reference mirroring the PyTorch module (dense graph model)."""
    x = jnp.concatenate([exer_emb, all_stu_emb], axis=0)
    uc = x @ params["wc"] + params["bc"]
    ui = x @ params["wi"] + params["bi"]
    fusion = jnp.concatenate([uc, ui], axis=-1) @ params["wf"] + params["bf"]
    return all_stu_emb + fusion[exer_n:]


def reference_forward_kernel_math(all_stu_emb, params):
    """Pure-JAX reference mirroring the kernel's fused bf16/f32 math exactly."""
    wci = jnp.concatenate([params["wc"], params["wi"]], axis=1).astype(jnp.bfloat16)
    wf = params["wf"].astype(jnp.bfloat16)
    b_eff = (jnp.concatenate([params["bc"], params["bi"]], axis=1) @ params["wf"]
             + params["bf"])
    g = jnp.dot(all_stu_emb.astype(jnp.bfloat16), wci,
                preferred_element_type=jnp.float32)
    fusion = jnp.dot(g.astype(jnp.bfloat16), wf,
                     preferred_element_type=jnp.float32) + b_eff
    return all_stu_emb + fusion


if __name__ == "__main__":
    # Small, module-consistent sizes; TM policy caps the tile so the grid has
    # 2 steps (and the second block is a partial/edge block) even at S=24.
    exer_n, student_n, knowledge_dim = 8, 24, 32

    key = jax.random.PRNGKey(0)
    k_exer, k_stu, k_params = jax.random.split(key, 3)

    exer_emb = jax.random.normal(k_exer, (exer_n, knowledge_dim), jnp.float32)
    all_stu_emb = jax.random.normal(k_stu, (student_n, knowledge_dim), jnp.float32)
    params = init_params(k_params, knowledge_dim)

    # Compute references before the kernel call (the kernel output aliases the
    # student-embedding input when donated).
    ref_f32 = reference_forward_f32(exer_emb, all_stu_emb, params, exer_n)
    ref_krn = reference_forward_kernel_math(all_stu_emb, params)

    run = jax.jit(functools.partial(expression_single_eva))
    out = jax.block_until_ready(run(exer_emb, all_stu_emb, params))

    assert out.shape == (student_n, knowledge_dim)

    # exact-math check against a reference using the same fused bf16/f32 math
    assert jnp.allclose(out, ref_krn, atol=1e-3, rtol=1e-3), "mismatch vs kernel-math reference"

    # fidelity check against the full-f32 PyTorch-equivalent reference
    assert jnp.allclose(out, ref_f32, atol=5e-2, rtol=5e-2), "mismatch vs f32 reference"

    print("KERNEL_OK")
</pallas_src>

<mosaic_0001>
module attributes {stable_mosaic.version = 11 : i64} {
  func.func @_kernel(%arg0: i32, %arg1: memref<16x32xf32, #tpu.memory_space<vmem>>, %arg2: memref<32x64xbf16, #tpu.memory_space<vmem>>, %arg3: memref<64x32xbf16, #tpu.memory_space<vmem>>, %arg4: memref<1x32xf32, #tpu.memory_space<vmem>>, %arg5: memref<16x32xf32, #tpu.memory_space<vmem>>) attributes {dimension_semantics = [#tpu.dimension_semantics<parallel>], iteration_bounds = array<i64: 2>, scalar_prefetch = 0 : i64, scratch_operands = 0 : i64, tpu.core_type = #tpu.core_type<tc>, window_params = [{transform_indices = @transform_0, window_bounds = array<i64: 16, 32>}, {pipeline_mode = #tpu.pipeline_mode<synchronous>, transform_indices = @transform_1, window_bounds = array<i64: 32, 64>}, {pipeline_mode = #tpu.pipeline_mode<synchronous>, transform_indices = @transform_2, window_bounds = array<i64: 64, 32>}, {pipeline_mode = #tpu.pipeline_mode<synchronous>, transform_indices = @transform_3, window_bounds = array<i64: 1, 32>}, {transform_indices = @transform_4, window_bounds = array<i64: 16, 32>}]} {
    %c0 = arith.constant 0 : index
    %c0_0 = arith.constant 0 : index
    %0 = vector.load %arg1[%c0, %c0_0] : memref<16x32xf32, #tpu.memory_space<vmem>>, vector<16x32xf32>
    %1 = arith.truncf %0 : vector<16x32xf32> to vector<16x32xbf16>
    %c0_1 = arith.constant 0 : index
    %c0_2 = arith.constant 0 : index
    %2 = vector.load %arg2[%c0_1, %c0_2] : memref<32x64xbf16, #tpu.memory_space<vmem>>, vector<32x64xbf16>
    %cst = arith.constant dense<0.000000e+00> : vector<16x64xf32>
    %3 = tpu.matmul %1, %2, %cst {dimension_numbers = #tpu.dot_dimension_numbers<[1], [0], [0], [1], [0, 0, 1, 1], [], []>} : vector<16x32xbf16>, vector<32x64xbf16>, vector<16x64xf32> -> vector<16x64xf32>
    %4 = arith.truncf %3 : vector<16x64xf32> to vector<16x64xbf16>
    %c0_3 = arith.constant 0 : index
    %c0_4 = arith.constant 0 : index
    %5 = vector.load %arg3[%c0_3, %c0_4] : memref<64x32xbf16, #tpu.memory_space<vmem>>, vector<64x32xbf16>
    %cst_5 = arith.constant dense<0.000000e+00> : vector<16x32xf32>
    %6 = tpu.matmul %4, %5, %cst_5 {dimension_numbers = #tpu.dot_dimension_numbers<[1], [0], [0], [1], [0, 0, 1, 1], [], []>} : vector<16x64xbf16>, vector<64x32xbf16>, vector<16x32xf32> -> vector<16x32xf32>
    %c0_6 = arith.constant 0 : index
    %c0_7 = arith.constant 0 : index
    %7 = vector.load %arg4[%c0_6, %c0_7] : memref<1x32xf32, #tpu.memory_space<vmem>>, vector<1x32xf32>
    %8 = vector.broadcast %7 : vector<1x32xf32> to vector<16x32xf32>
    %9 = arith.addf %6, %8 : vector<16x32xf32>
    %10 = arith.addf %0, %9 : vector<16x32xf32>
    %c0_8 = arith.constant 0 : index
    %c0_9 = arith.constant 0 : index
    %11 = vector.load %arg5[%c0_8, %c0_9] : memref<16x32xf32, #tpu.memory_space<vmem>>, vector<16x32xf32>
    tpu.vector_store %arg5[%c0_8, %c0_9], %10 {strides = array<i32>} : memref<16x32xf32, #tpu.memory_space<vmem>>, vector<16x32xf32>,
    return
  }
  func.func @transform_0(%arg0: i32) -> (i32, i32) {
    %c0_i32 = arith.constant 0 : i32
    %c0_i32_0 = arith.constant 0 : i32
    return %arg0, %c0_i32 : i32, i32
  }
  func.func @transform_1(%arg0: i32) -> (i32, i32) {
    %c0_i32 = arith.constant 0 : i32
    %c0_i32_0 = arith.constant 0 : i32
    %c0_i32_1 = arith.constant 0 : i32
    return %c0_i32, %c0_i32_0 : i32, i32
  }
  func.func @transform_2(%arg0: i32) -> (i32, i32) {
    %c0_i32 = arith.constant 0 : i32
    %c0_i32_0 = arith.constant 0 : i32
    %c0_i32_1 = arith.constant 0 : i32
    return %c0_i32, %c0_i32_0 : i32, i32
  }
  func.func @transform_3(%arg0: i32) -> (i32, i32) {
    %c0_i32 = arith.constant 0 : i32
    %c0_i32_0 = arith.constant 0 : i32
    %c0_i32_1 = arith.constant 0 : i32
    return %c0_i32, %c0_i32_0 : i32, i32
  }
  func.func @transform_4(%arg0: i32) -> (i32, i32) {
    %c0_i32 = arith.constant 0 : i32
    %c0_i32_0 = arith.constant 0 : i32
    return %arg0, %c0_i32 : i32, i32
  }
}

</mosaic_0001>

<bundles_post_ra>
// kernel: expression_single_eva.1
= control target key start
LH: loop header
LB: loop body
LE: loop exit
PB: predicated region body
PF: predicated region fallthrough
CT: control target
= control target key end

     0   :  { %9 = vsyncpa [#allocation3], 0  ;;  %s918_s0 = inlined_call_operand.hbm [shape: f32[24,32], index: 0, kind: input, shape index: {}, may-alias: {0,4}]   ;;  %s919_s1 = inlined_call_operand.vmem [shape: bf16[32,64], index: 1, kind: input, shape index: {}]   ;;  %s920_s2 = inlined_call_operand.vmem [shape: bf16[64,32], index: 2, kind: input, shape index: {}]   ;;  %s921_s3 = inlined_call_operand.vmem [shape: f32[1,32], index: 3, kind: input, shape index: {}]   ;;  %s922_s4 = inlined_call_operand.hbm [shape: f32[24,32], index: 4, kind: output, shape index: {}, may-alias: {0,4}]  }
   0x1   :  { %11 = vsyncpa [#allocation3 + $0x1], 0 }
   0x2   :  { %12 = vsyncpa [#allocation4], 0 }
   0x3   :  { %14 = vsyncpa [#allocation4 + $0x1], 0  ;;  %s720_s15 = smov 0   ;;  %s722_s16 = smov 0  }
   0x4   :  { %s724_s17 = smov 0   ;;  %s726_s18 = smov 0  }
   0x5 LB: > { %s741_s19 = sadd.s32 4294967295, %s685_s18   ;;  %s479_s20 = sadd.s32 4294967294, %s685_s18   ;;  %s685_s18 = sphi %s726_s18, %s932_s18   ;;  %s681_s17 = sphi %s724_s17, %s931_s17   ;;  %s677_s16 = sphi %s722_s16, %s930_s16   ;;  %s673_s15 = sphi %s720_s15, %s929_s15  }
   0x6   : > { %s745_s21 = sadd.s32 1, %s685_s18   ;;  %s27_s22 = sadd.s32 1, %s681_s17 }
   0x7   : > { %s24_s23 = ssub.s32 %s685_s18, %s745_s21  ;;  %p34_p0 = scmp.ne.s32.totalorder %s681_s17, %s677_s16 }
   0x8   : > { %p25_p1 = scmp.eq.s32.totalorder %s24_s23, 0  ;;  %p35_p2 = scmp.eq.s32.totalorder %s685_s18, 0 }
   0x9   : > { %p40_p3 = scmp.ne.s32.totalorder %s677_s16, %s673_s15  ;;  %p41_p4 = scmp.eq.s32.totalorder %s741_s19, 0 }
   0xa   : > { %s757_s24 = scalar_select %p25_p1, %s681_s17, %s27_s22  }
   0xb   : > { %p36_p5 = por %p35_p2, %p34_p0  ;;  %p759_p6 = por %p41_p4, %p40_p3 }
   0xc   : > { %p127_p7 = scmp.eq.s32.totalorder %s741_s19, 1  ;;  %p133_p8 = scmp.eq.s32.totalorder %s479_s20, 1 }
   0xd   : > { %p923_p11 = scmp.ge.s32.totalorder %s685_s18, 2 }
   0xe   : > { %p764_p9 = por %p127_p7, %p34_p0  ;;  %p768_p10 = por %p133_p8, %p40_p3 }
   0xf   : > { %158 = sbr.rel (%p923_p11) target bundleno = 57 (0x39), region = 28 }
  0x10   : > { %s926_s27 = scalar_select %p768_p10, 1, 0 }
  0x16   : > { %161 = sbr.rel (!%p36_p5) target bundleno = 57 (0x39), region = 32  ;;  %s162_s28 = sand.u32 (%p36_p5), 1, %s681_s17  }
  0x17   : > { %s483_s29 = sshll.u32 (%p36_p5), %s685_s18, 1  ;;  %s482_s30 = sshll.u32 (%p36_p5), %s162_s28, 4 }
  0x18   : > { %s168_s5 = ssub.s32 (%p36_p5), 3, %s483_s29  ;;  %s780_s8 = scalar_lea.sflag (%p36_p5), [#allocation3], %s162_s28 }
  0x19   : > { %p169_p12 = scmp.lt.s32.totalorder (%p36_p5), %s168_s5, 2  ;;  %s166_s9 = scalar_lea.vmem (%p36_p5), [#allocation2], %s482_s30 }
  0x1d   : > { %s934_s5 = smov (!%p169_p12, %s168_s5), 2 }
  0x1e   : > { %s777_s6 = sshll.u32 %s934_s5, 7 }
  0x1f   : > { %s173_s7 = ssub.s32 256, %s777_s6 }
  0x20   : > { %174 = vsyncadd %s780_s8, %s173_s7  ;;  %p485_p13 = scmp.ne.s32.totalorder %s777_s6, 0  ;;  %s510_s10 = sshll.u32 %s685_s18, 8 }
  0x21   : > { %s788_s13 = scalar_lea.hbm %s918_s0, %s510_s10  ;;  %s179_s14 = sshll.u32 %s166_s9, 4  ;;  %s790_s14 = int_to_ptr.vmem [resolvable:$true] %s179_s14 }
  0x22   : > { %s591_s20 = scalar_lea.hbm %s788_s13, %s777_s6  ;;  %s595_s28 = scalar_lea.hbm %s918_s0, 384 }
  0x23   : > { %p592_p0 = scmp.ne.s32.totalorder %s788_s13, %s591_s20  ;;  %p596_p3 = scmp.lt.u32.totalorder %s788_s13, %s918_s0 }
  0x24   : > { %p597_p4 = scmp.lt.u32.totalorder %s595_s28, %s591_s20  ;;  %p599_p7 = scmp.lt.u32.totalorder %s591_s20, %s788_s13 }
  0x25   : > { %p593_p1 = pnand %p592_p0, %p485_p13 }
  0x26   : > { %p598_p5 = por %p597_p4, %p596_p3 }
  0x27   : > { %p594_p2 = pneg %p593_p1 }
  0x28   : > { %p600_p8 = por %p599_p7, %p598_p5 }
  0x2a   : > { %p601_p12 = pnand %p600_p8, %p594_p2 }
  0x2c   : > { %604 = shalt.err (!%p601_p12)
}
  0x2d   : > { %s605_s5 = scalar_lea.vmem %s790_s14, %s777_s6  ;;  %s687_s7 = smov [#allocation2]  }
  0x2e   : > { %p606_p0 = scmp.ne.s32.totalorder %s790_s14, %s605_s5  ;;  %s609_s9 = sshll.u32 %s687_s7, 4  ;;  %s610_s9 = int_to_ptr.vmem [resolvable:$false] %s609_s9 }
  0x2f   : > { %s611_s10 = scalar_lea.vmem %s610_s9, 512  ;;  %p612_p10 = scmp.lt.s32.totalorder %s790_s14, %s610_s9 }
  0x30   : > { %p607_p1 = pnand %p606_p0, %p485_p13  ;;  %p613_p3 = scmp.lt.s32.totalorder %s611_s10, %s605_s5 }
  0x32   : > { %p608_p11 = pneg %p607_p1  ;;  %p614_p4 = por %p613_p3, %p612_p10 }
  0x34   : > { %p615_p5 = pnand %p614_p4, %p608_p11 }
  0x36   : > { %618 = shalt.err (!%p615_p5)
}
  0x37   : > { %s688_s11 = smov 128   ;;  %s689_s12 = smov 8  }
  0x38   : > { %185 = dma.hbm_to_vmem [thread:$0]  (%p485_p13), %s788_s13, %s777_s6, %s790_s14, %s780_s8, %s688_s11, %s688_s11, %s689_s12  }
  0x39 PF: > { %p489_p2 = scmp.ge.s32.totalorder %s685_s18, 1  ;;  %p187_p7 = scmp.lt.s32.totalorder %s685_s18, 3 }
  0x3b   : > { %p188_p8 = pnand %p489_p2, %p187_p7 }
  0x3c   : > { %s820_s20 = sand.u32 (!%p188_p8), 1, %s677_s16  }
  0x3d   : > { %191 = sbr.rel (%p188_p8) target bundleno = 542 (0x21e), region = 36  ;;  %s490_s22 = sshll.u32 (!%p188_p8), %s820_s20, 4 }
  0x3e   : > { %s194_s23 = scalar_lea.sflag (!%p188_p8), [#allocation3], %s820_s20  ;;  %s197_s28 = scalar_lea.vmem (!%p188_p8), [#allocation2], %s490_s22 }
  0x44   : > { %664 = dma.done.wait (%p759_p6), %s194_s23, 256  }
  0x45   : > { %666 = vsyncadd (%p759_p6), %s194_s23, 4294967040  ;;  %v690_v0 = vmov 0.0   ;;  %vm691_vm0 = vmmov 0   ;;  %v585_v1 = vld [vmem:[%s919_s1] sm:$0xff]   ;;  %v586_v2 = vld [vmem:[%s919_s1 + $0x8] sm:$0xff]   ;;  %vm252_vm1 = vcmask 261120  }
  0x46   : > { %520 = vmatprep.subr.bf16.mxu0 %v690_v0  ;;  %524 = vmatprep.mubr.msk.bf16.mxu0 %vm691_vm0, %v690_v0  ;;  %v233_v3 = vld [vmem:[%s197_s28] sm:$0xff]  ;;  %v234_v4 = vld [vmem:[%s197_s28 + $0x8] sm:$0xff]  ;;  %vm337_vm2 = vcmask 523264   ;;  %s221_s28 = scalar_lea.vmem [#allocation5], %s490_s22  ;;  %s387_s6 = scalar_lea.sflag [#allocation4], %s820_s20 }
  0x47   : > { %528 = vmatprep.subr.bf16.mxu1 %v690_v0  ;;  %536 = vmatprep.mubr.msk.bf16.mxu1 %vm691_vm0, %v690_v0  ;;  %v587_v5 = vld [vmem:[%s920_s2] sm:$0xff]   ;;  %v235_v6 = vpack.c.bf16 %v234_v4, %v233_v3  ;;  %v588_v7 = vld [vmem:[%s920_s2 + $0x8] sm:$0xff]   ;;  %v589_v8 = vld [vmem:[%s920_s2 + $0x10] sm:$0xff]   ;;  %s502_s8 = sshll.u32 (%p764_p9), %s741_s19, 1 }
  0x48   : > { %521 = vmatpush3.bf16.msra.mxu0 %v585_v1  ;;  %529 = vmatpush3.bf16.msra.mxu1 %v587_v5  ;;  %v590_v9 = vld [vmem:[%s920_s2 + $0x18] sm:$0xff]   ;;  %v495_v15 = vld [vmem:[%s921_s3] ss:$0 sm:$0xff]  ;;  %s395_s13 = ssub.s32 (%p764_p9), 3, %s502_s8 }
  0x49   : > { %522 = vmatprep.subr.bf16.mxu0 %v690_v0  ;;  %530 = vmatprep.subr.bf16.mxu1 %v690_v0  ;;  %p396_p6 = scmp.lt.s32.totalorder (%p764_p9), %s395_s13, 2 }
  0x4c   : > { %523 = vmatpush3.bf16.msra.mxu0 %v586_v2  ;;  %531 = vmatpush3.bf16.msra.mxu1 %v588_v7 }
  0x4d   : > { %532 = vmatprep.subr.bf16.mxu1 %v690_v0 }
  0x4f   : > { %525 = vmatmul.mubr.msk.bf16.vlgmr.msra.gmra.mrb[0].mxu0 %vm252_vm1, %v235_v6 }
  0x50   : > { %533 = vmatpush3.bf16.msra.mxu1 %v589_v8 }
  0x51   : > { %534 = vmatprep.subr.bf16.mxu1 %v690_v0 }
  0x54   : > { %535 = vmatpush3.bf16.msra.mxu1 %v590_v9 }
 0x122   : > { %v290_v10 = vpop.f32.mrb[0].mxu0 }
 0x123   : > { %v526_v11 = vpop.f32.mrb[1].mxu0 }
 0x124   : > { %v293_v12 = vpop.f32.mrb[2].mxu0 }
 0x125   : > { %v297_v13 = vpack.c.bf16 %v293_v12, %v290_v10  ;;  %v527_v14 = vpop.f32.mrb[3].mxu0 }
 0x127   : > { %537 = vmatmul.mubr.msk.bf16.vlgmr.msra.gmra.mrb[0].mxu1 %vm337_vm2, %v297_v13 }
 0x1fa   : > { %v375_v16 = vpop.f32.mrb[0].mxu1 }
 0x1fb   : > { %v376_v17 = vadd.f32 %v495_v15, %v375_v16  ;;  %v538_v18 = vpop.f32.mrb[1].mxu1  ;;  %393 = sbr.rel (!%p764_p9) target bundleno = 542 (0x21e), region = 44 }
 0x1fc   : > { %v378_v19 = vpop.f32.mrb[2].mxu1 }
 0x1fd   : > { %v382_v20 = vadd.f32 %v376_v17, %v233_v3  ;;  %v379_v21 = vadd.f32 %v495_v15, %v378_v19  ;;  %v539_v22 = vpop.f32.mrb[3].mxu1 }
 0x1ff   : > { %384 = vst.msk [vmem:[%s221_s28] sm:$0xff] %vm252_vm1, %v382_v20  ;;  %v383_v23 = vadd.f32 %v379_v21, %v234_v4 }
 0x201   : > { %385 = vst.msk [vmem:[%s221_s28 + $0x8] sm:$0xff] %vm252_vm1, %v383_v23 }
 0x202   : > { %s936_s13 = smov (!%p396_p6, %s395_s13), 2 }
 0x203   : > { %s860_s14 = sshll.u32 %s936_s13, 7 }
 0x204   : > { %s400_s25 = ssub.s32 256, %s860_s14 }
 0x205   : > { %401 = vsyncadd %s387_s6, %s400_s25  ;;  %p504_p10 = scmp.ne.s32.totalorder %s860_s14, 0  ;;  %s511_s22 = sshll.u32 %s741_s19, 8 }
 0x206   : > { %s870_s30 = scalar_lea.hbm %s922_s4, %s511_s22  ;;  %s406_s5 = sshll.u32 %s221_s28, 4  ;;  %s872_s5 = int_to_ptr.vmem [resolvable:$true] %s406_s5 }
 0x207   : > { %s619_s7 = scalar_lea.vmem %s872_s5, %s860_s14  ;;  %s692_s9 = smov [#allocation5]  }
 0x208   : > { %p620_p9 = scmp.ne.s32.totalorder %s872_s5, %s619_s7  ;;  %s623_s10 = sshll.u32 %s692_s9, 4  ;;  %s624_s10 = int_to_ptr.vmem [resolvable:$false] %s623_s10 }
 0x209   : > { %s625_s19 = scalar_lea.vmem %s624_s10, 512  ;;  %p626_p12 = scmp.lt.s32.totalorder %s872_s5, %s624_s10 }
 0x20a   : > { %p621_p11 = pnand %p620_p9, %p504_p10  ;;  %p627_p0 = scmp.lt.s32.totalorder %s625_s19, %s619_s7 }
 0x20c   : > { %p622_p13 = pneg %p621_p11  ;;  %p628_p1 = por %p627_p0, %p626_p12 }
 0x20e   : > { %p629_p3 = pnand %p628_p1, %p622_p13 }
 0x210   : > { %632 = shalt.err (!%p629_p3)
}
 0x211   : > { %s633_s11 = scalar_lea.hbm %s870_s30, %s860_s14  ;;  %s637_s28 = scalar_lea.hbm %s922_s4, 384 }
 0x212   : > { %p634_p4 = scmp.ne.s32.totalorder %s870_s30, %s633_s11  ;;  %p638_p7 = scmp.lt.u32.totalorder %s870_s30, %s922_s4 }
 0x213   : > { %p639_p8 = scmp.lt.u32.totalorder %s637_s28, %s633_s11  ;;  %p641_p9 = scmp.lt.u32.totalorder %s633_s11, %s870_s30 }
 0x214   : > { %p635_p5 = pnand %p634_p4, %p504_p10 }
 0x215   : > { %p640_p6 = por %p639_p8, %p638_p7 }
 0x216   : > { %p636_p2 = pneg %p635_p5 }
 0x217   : > { %p642_p11 = por %p641_p9, %p640_p6 }
 0x219   : > { %p643_p13 = pnand %p642_p11, %p636_p2 }
 0x21b   : > { %646 = shalt.err (!%p643_p13)
}
 0x21c   : > { %s693_s25 = smov 128   ;;  %s694_s22 = smov 8  }
 0x21d   : > { %412 = dma.vmem_to_hbm [thread:$0]  (%p504_p10), %s872_s5, %s860_s14, %s870_s30, %s387_s6, %s693_s25, %s693_s25, %s694_s22  }
 0x21e PF: > { %s421_s26 = sand.u32 1, %s673_s15   ;;  %p927_p12 = scmp.ne.s32.totalorder %s926_s27, 0 }
 0x21f   : > { %p928_p0 = scmp.ge.s32.totalorder %s685_s18, 2  ;;  %s422_s29 = scalar_lea.sflag [#allocation4], %s421_s26 }
 0x221   : > { %p543_p1 = pnand %p928_p0, %p927_p12 }
 0x223   : > { %668 = dma.done.wait (!%p543_p1), %s422_s29, 256  }
 0x224   : > { %670 = vsyncadd (!%p543_p1), %s422_s29, 4294967040  ;;  %p17_p3 = scmp.ge.s32.totalorder %s745_s21, 4   ;;  %s929_s15 = smov %s677_s16 }
 0x225   : > { %s930_s16 = smov %s681_s17  ;;  %s931_s17 = smov %s757_s24 }
 0x226   : > { %s932_s18 = smov %s745_s21  ;;  %19 = sbr.rel (!%p17_p3) target bundleno = 5 (0x5), region = 81 }
 0x22d   :  { %427 = vsyncpa [#allocation3], 1 }
 0x22e   :  { %429 = vsyncpa [#allocation3 + $0x1], 1 }
 0x22f   :  { %430 = vsyncpa [#allocation4], 1 }
 0x230   :  { %432 = vsyncpa [#allocation4 + $0x1], 1 }

</bundles_post_ra>
